<compile_context>
chip_gen: v5e
topology: v5e:2x2
jax: 0.10.0
libtpu: 0.0.40
codegen_flags: <defaults>
</compile_context>

<pallas_src>
import math

import jax
import jax.numpy as jnp
from jax.experimental import pallas as pl
from jax.experimental.pallas import tpu as pltpu


def _round_up(x, m):
    return ((x + m - 1) // m) * m


def _cdiv(a, b):
    return (a + b - 1) // b


def _discriminator_kernel(x_ref, w1_ref, b1_ref, w2_ref, b2_ref, w3_ref, b3_ref,
                          out_ref):
    """One batch tile of the MLP, feature-major (batch sits in the lane axis).

    x_ref : [n_states, TB]        compute dtype (bf16)
    w*    : [out, in]             compute dtype (PyTorch nn.Linear layout)
    b*    : [out, 1]              float32
    out   : [n_skills_pad, TB]    out dtype (f32)
    """
    cdt = w1_ref.dtype
    x = x_ref[...].astype(cdt)

    # hidden1 + ReLU   (MXU accumulates in f32; bias/ReLU on the VPU in f32)
    h1 = jnp.dot(w1_ref[...], x, preferred_element_type=jnp.float32) + b1_ref[...]
    h1 = jnp.maximum(h1, 0.0).astype(cdt)

    # hidden2 + ReLU
    h2 = jnp.dot(w2_ref[...], h1, preferred_element_type=jnp.float32) + b2_ref[...]
    h2 = jnp.maximum(h2, 0.0).astype(cdt)

    # q head (logits, no activation)
    out_ref[...] = (jnp.dot(w3_ref[...], h2, preferred_element_type=jnp.float32)
                    + b3_ref[...]).astype(out_ref.dtype)


def discriminator_forward(states, params, *, block_b=16384,
                          compute_dtype=jnp.bfloat16,
                          out_dtype=jnp.float32,
                          states_feature_major=False,
                          return_feature_major=False):
    """states: [B, n_states] (or [n_states, B] if states_feature_major)
       -> logits [B, n_skills] (or [n_skills, B] if return_feature_major)."""
    w1, b1, w2, b2, w3, b3 = params          # w: [out, in], b: [out, 1]

    if states_feature_major:
        n_states, B = states.shape
        x_t = states
    else:
        B, n_states = states.shape
        x_t = jnp.transpose(states)          # fused into input DMA when possible
    x_t = x_t.astype(compute_dtype)

    hidden = w1.shape[0]
    n_skills = w3.shape[0]
    n_skills_pad = _round_up(n_skills, 8)    # unmasked f32 output stores

    # Pad batch only to a lane multiple (128), never to a multiple of tb.
    b_pad = _round_up(B, 128)
    if b_pad != B:
        x_t = jnp.pad(x_t, ((0, 0), (0, b_pad - B)))

    # Batch tile: big (amortize per-grid-step overhead), capped by batch size
    # and by VMEM (tb=16384 -> ~14 MiB live, fits v7x's limit).
    tb = max(128, min(_round_up(block_b, 128), b_pad))
    steps = _cdiv(b_pad, tb)
    if steps == 1 and b_pad >= 256:
        # Ensure >=2 grid steps so the "parallel" axis splits across both
        # TensorCores on v7x.
        tb = _round_up(_cdiv(b_pad, 2), 128)
        steps = _cdiv(b_pad, tb)
    grid = (steps,)

    # Zero-pad the q head to n_skills_pad rows (tiny, done once).
    if n_skills_pad != n_skills:
        w3 = jnp.pad(w3, ((0, n_skills_pad - n_skills), (0, 0)))
        b3 = jnp.pad(b3, ((0, n_skills_pad - n_skills), (0, 0)))

    w1c = w1.astype(compute_dtype)
    w2c = w2.astype(compute_dtype)
    w3c = w3.astype(compute_dtype)

    cbytes = jnp.dtype(compute_dtype).itemsize
    obytes = jnp.dtype(out_dtype).itemsize
    n_w_elems = n_states * hidden + hidden * hidden + hidden * n_skills_pad
    b_eff = steps * tb
    cost = pl.CostEstimate(
        flops=2 * b_eff * n_w_elems,
        transcendentals=0,
        bytes_accessed=(b_eff * n_states * cbytes          # states
                        + n_w_elems * cbytes               # weights
                        + (2 * hidden + n_skills_pad) * 4  # biases
                        + b_eff * n_skills_pad * obytes))  # logits out

    out_t = pl.pallas_call(
        _discriminator_kernel,
        out_shape=jax.ShapeDtypeStruct((n_skills_pad, b_pad), out_dtype),
        grid_spec=pltpu.PrefetchScalarGridSpec(
            num_scalar_prefetch=0,
            grid=grid,
            in_specs=[
                pl.BlockSpec((n_states, tb), lambda i: (0, i)),       # states tile
                pl.BlockSpec((hidden, n_states), lambda i: (0, 0)),   # w1 (resident)
                pl.BlockSpec((hidden, 1), lambda i: (0, 0)),          # b1
                pl.BlockSpec((hidden, hidden), lambda i: (0, 0)),     # w2
                pl.BlockSpec((hidden, 1), lambda i: (0, 0)),          # b2
                pl.BlockSpec((n_skills_pad, hidden), lambda i: (0, 0)),  # w3
                pl.BlockSpec((n_skills_pad, 1), lambda i: (0, 0)),    # b3
            ],
            out_specs=pl.BlockSpec((n_skills_pad, tb), lambda i: (0, i)),
        ),
        compiler_params=pltpu.CompilerParams(
            dimension_semantics=("parallel",),      # megacore split on v7x
            vmem_limit_bytes=32 * 1024 * 1024,
            # Let XLA fuse the transpose/cast producer into the states DMA.
            allow_input_fusion=[True, False, False, False, False, False, False],
        ),
        cost_estimate=cost,
    )(x_t, w1c, b1, w2c, b2, w3c, b3)

    out_t = out_t[:n_skills]
    if return_feature_major:
        return out_t[:, :B]                  # [n_skills, B], no extra transpose pass
    return jnp.transpose(out_t)[:B]          # PyTorch layout [B, n_skills]


def init_discriminator_params(key, n_states, n_skills, hidden=64):
    """Matches the PyTorch module's init_weight():
       - hidden1, hidden2: kaiming (He) normal, std = sqrt(2 / fan_in)
       - q:                xavier uniform, bound = sqrt(6 / (fan_in + fan_out))
       - all biases zero.
       Weights stored in PyTorch's [out, in] layout; biases as [out, 1]."""
    k1, k2, k3 = jax.random.split(key, 3)

    std1 = math.sqrt(2.0 / n_states)
    w1 = std1 * jax.random.normal(k1, (hidden, n_states), dtype=jnp.float32)
    b1 = jnp.zeros((hidden, 1), dtype=jnp.float32)

    std2 = math.sqrt(2.0 / hidden)
    w2 = std2 * jax.random.normal(k2, (hidden, hidden), dtype=jnp.float32)
    b2 = jnp.zeros((hidden, 1), dtype=jnp.float32)

    bound3 = math.sqrt(6.0 / (hidden + n_skills))
    w3 = jax.random.uniform(k3, (n_skills, hidden), dtype=jnp.float32,
                            minval=-bound3, maxval=bound3)
    b3 = jnp.zeros((n_skills, 1), dtype=jnp.float32)

    return (w1, b1, w2, b2, w3, b3)


if __name__ == "__main__":
    key = jax.random.PRNGKey(0)
    k_params, k_states = jax.random.split(key)

    batch = 2
    n_states = 8     # observation dim
    n_skills = 4     # number of DIAYN skills

    params = init_discriminator_params(k_params, n_states, n_skills)
    states = jax.random.normal(k_states, (batch, n_states), dtype=jnp.float32)

    logits = discriminator_forward(states, params)
    jax.block_until_ready(logits)
    assert logits.shape == (batch, n_skills)

    w1, b1, w2, b2, w3, b3 = params

    # bf16-mirrored reference (same casts as the kernel) -> tight-ish check.
    cdt = jnp.bfloat16
    xr = states.astype(cdt).T
    h1 = jnp.maximum(jnp.dot(w1.astype(cdt), xr,
                             preferred_element_type=jnp.float32) + b1, 0.0).astype(cdt)
    h2 = jnp.maximum(jnp.dot(w2.astype(cdt), h1,
                             preferred_element_type=jnp.float32) + b2, 0.0).astype(cdt)
    ref_bf16 = (jnp.dot(w3.astype(cdt), h2,
                        preferred_element_type=jnp.float32) + b3).T
    assert jnp.allclose(logits, ref_bf16, atol=3e-2, rtol=3e-2)

    # Full-precision PyTorch-equivalent reference -> loose check (bf16 compute).
    r = jnp.maximum(states @ w1.T + b1[:, 0], 0.0)
    r = jnp.maximum(r @ w2.T + b2[:, 0], 0.0)
    ref_f32 = r @ w3.T + b3[:, 0]
    assert jnp.allclose(logits, ref_f32, atol=6e-2, rtol=6e-2)

    print("KERNEL_OK")
</pallas_src>

<mosaic_0001>
module attributes {stable_mosaic.version = 11 : i64} {
  func.func @_discriminator_kernel(%arg0: i32, %arg1: memref<8x128xbf16, #tpu.memory_space<vmem>>, %arg2: memref<64x8xbf16, #tpu.memory_space<vmem>>, %arg3: memref<64x1xf32, #tpu.memory_space<vmem>>, %arg4: memref<64x64xbf16, #tpu.memory_space<vmem>>, %arg5: memref<64x1xf32, #tpu.memory_space<vmem>>, %arg6: memref<8x64xbf16, #tpu.memory_space<vmem>>, %arg7: memref<8x1xf32, #tpu.memory_space<vmem>>, %arg8: memref<8x128xf32, #tpu.memory_space<vmem>>) attributes {dimension_semantics = [#tpu.dimension_semantics<parallel>], iteration_bounds = array<i64: 1>, scalar_prefetch = 0 : i64, scratch_operands = 0 : i64, tpu.core_type = #tpu.core_type<tc>, window_params = [{transform_indices = @transform_0, window_bounds = array<i64: 8, 128>}, {pipeline_mode = #tpu.pipeline_mode<synchronous>, transform_indices = @transform_1, window_bounds = array<i64: 64, 8>}, {pipeline_mode = #tpu.pipeline_mode<synchronous>, transform_indices = @transform_2, window_bounds = array<i64: 64, 1>}, {pipeline_mode = #tpu.pipeline_mode<synchronous>, transform_indices = @transform_3, window_bounds = array<i64: 64, 64>}, {pipeline_mode = #tpu.pipeline_mode<synchronous>, transform_indices = @transform_4, window_bounds = array<i64: 64, 1>}, {pipeline_mode = #tpu.pipeline_mode<synchronous>, transform_indices = @transform_5, window_bounds = array<i64: 8, 64>}, {pipeline_mode = #tpu.pipeline_mode<synchronous>, transform_indices = @transform_6, window_bounds = array<i64: 8, 1>}, {transform_indices = @transform_7, window_bounds = array<i64: 8, 128>}]} {
    %c0 = arith.constant 0 : index
    %c0_0 = arith.constant 0 : index
    %0 = vector.load %arg1[%c0, %c0_0] : memref<8x128xbf16, #tpu.memory_space<vmem>>, vector<8x128xbf16>
    %c0_1 = arith.constant 0 : index
    %c0_2 = arith.constant 0 : index
    %1 = vector.load %arg2[%c0_1, %c0_2] : memref<64x8xbf16, #tpu.memory_space<vmem>>, vector<64x8xbf16>
    %cst = arith.constant dense<0.000000e+00> : vector<64x128xf32>
    %2 = tpu.matmul %1, %0, %cst {dimension_numbers = #tpu.dot_dimension_numbers<[1], [0], [0], [1], [0, 0, 1, 1], [], []>} : vector<64x8xbf16>, vector<8x128xbf16>, vector<64x128xf32> -> vector<64x128xf32>
    %c0_3 = arith.constant 0 : index
    %c0_4 = arith.constant 0 : index
    %3 = vector.load %arg3[%c0_3, %c0_4] : memref<64x1xf32, #tpu.memory_space<vmem>>, vector<64x1xf32>
    %4 = vector.broadcast %3 : vector<64x1xf32> to vector<64x128xf32>
    %5 = arith.addf %2, %4 : vector<64x128xf32>
    %cst_5 = arith.constant 0.000000e+00 : f32
    %6 = vector.broadcast %cst_5 : f32 to vector<64x128xf32>
    %7 = arith.maximumf %5, %6 : vector<64x128xf32>
    %8 = arith.truncf %7 : vector<64x128xf32> to vector<64x128xbf16>
    %c0_6 = arith.constant 0 : index
    %c0_7 = arith.constant 0 : index
    %9 = vector.load %arg4[%c0_6, %c0_7] : memref<64x64xbf16, #tpu.memory_space<vmem>>, vector<64x64xbf16>
    %cst_8 = arith.constant dense<0.000000e+00> : vector<64x128xf32>
    %10 = tpu.matmul %9, %8, %cst_8 {dimension_numbers = #tpu.dot_dimension_numbers<[1], [0], [0], [1], [0, 0, 1, 1], [], []>} : vector<64x64xbf16>, vector<64x128xbf16>, vector<64x128xf32> -> vector<64x128xf32>
    %c0_9 = arith.constant 0 : index
    %c0_10 = arith.constant 0 : index
    %11 = vector.load %arg5[%c0_9, %c0_10] : memref<64x1xf32, #tpu.memory_space<vmem>>, vector<64x1xf32>
    %12 = vector.broadcast %11 : vector<64x1xf32> to vector<64x128xf32>
    %13 = arith.addf %10, %12 : vector<64x128xf32>
    %cst_11 = arith.constant 0.000000e+00 : f32
    %14 = vector.broadcast %cst_11 : f32 to vector<64x128xf32>
    %15 = arith.maximumf %13, %14 : vector<64x128xf32>
    %16 = arith.truncf %15 : vector<64x128xf32> to vector<64x128xbf16>
    %c0_12 = arith.constant 0 : index
    %c0_13 = arith.constant 0 : index
    %17 = vector.load %arg6[%c0_12, %c0_13] : memref<8x64xbf16, #tpu.memory_space<vmem>>, vector<8x64xbf16>
    %cst_14 = arith.constant dense<0.000000e+00> : vector<8x128xf32>
    %18 = tpu.matmul %17, %16, %cst_14 {dimension_numbers = #tpu.dot_dimension_numbers<[1], [0], [0], [1], [0, 0, 1, 1], [], []>} : vector<8x64xbf16>, vector<64x128xbf16>, vector<8x128xf32> -> vector<8x128xf32>
    %c0_15 = arith.constant 0 : index
    %c0_16 = arith.constant 0 : index
    %19 = vector.load %arg7[%c0_15, %c0_16] : memref<8x1xf32, #tpu.memory_space<vmem>>, vector<8x1xf32>
    %20 = vector.broadcast %19 : vector<8x1xf32> to vector<8x128xf32>
    %21 = arith.addf %18, %20 : vector<8x128xf32>
    %c0_17 = arith.constant 0 : index
    %c0_18 = arith.constant 0 : index
    %22 = vector.load %arg8[%c0_17, %c0_18] : memref<8x128xf32, #tpu.memory_space<vmem>>, vector<8x128xf32>
    tpu.vector_store %arg8[%c0_17, %c0_18], %21 {strides = array<i32>} : memref<8x128xf32, #tpu.memory_space<vmem>>, vector<8x128xf32>,
    return
  }
  func.func @transform_0(%arg0: i32) -> (i32, i32) {
    %c0_i32 = arith.constant 0 : i32
    %c0_i32_0 = arith.constant 0 : i32
    return %c0_i32, %arg0 : i32, i32
  }
  func.func @transform_1(%arg0: i32) -> (i32, i32) {
    %c0_i32 = arith.constant 0 : i32
    %c0_i32_0 = arith.constant 0 : i32
    %c0_i32_1 = arith.constant 0 : i32
    return %c0_i32, %c0_i32_0 : i32, i32
  }
  func.func @transform_2(%arg0: i32) -> (i32, i32) {
    %c0_i32 = arith.constant 0 : i32
    %c0_i32_0 = arith.constant 0 : i32
    %c0_i32_1 = arith.constant 0 : i32
    return %c0_i32, %c0_i32_0 : i32, i32
  }
  func.func @transform_3(%arg0: i32) -> (i32, i32) {
    %c0_i32 = arith.constant 0 : i32
    %c0_i32_0 = arith.constant 0 : i32
    %c0_i32_1 = arith.constant 0 : i32
    return %c0_i32, %c0_i32_0 : i32, i32
  }
  func.func @transform_4(%arg0: i32) -> (i32, i32) {
    %c0_i32 = arith.constant 0 : i32
    %c0_i32_0 = arith.constant 0 : i32
    %c0_i32_1 = arith.constant 0 : i32
    return %c0_i32, %c0_i32_0 : i32, i32
  }
  func.func @transform_5(%arg0: i32) -> (i32, i32) {
    %c0_i32 = arith.constant 0 : i32
    %c0_i32_0 = arith.constant 0 : i32
    %c0_i32_1 = arith.constant 0 : i32
    return %c0_i32, %c0_i32_0 : i32, i32
  }
  func.func @transform_6(%arg0: i32) -> (i32, i32) {
    %c0_i32 = arith.constant 0 : i32
    %c0_i32_0 = arith.constant 0 : i32
    %c0_i32_1 = arith.constant 0 : i32
    return %c0_i32, %c0_i32_0 : i32, i32
  }
  func.func @transform_7(%arg0: i32) -> (i32, i32) {
    %c0_i32 = arith.constant 0 : i32
    %c0_i32_0 = arith.constant 0 : i32
    return %c0_i32, %arg0 : i32, i32
  }
}

</mosaic_0001>

<bundles_post_ra>
// kernel: tpu_custom_call.1
= control target key start
LH: loop header
LB: loop body
LE: loop exit
PB: predicated region body
PF: predicated region fallthrough
CT: control target
= control target key end

     0   :  { %vm118_vm0 = vcmask 1043456   ;;  %v422_v2 = vmov 0   ;;  %vm105_vm1 = vcmask 64512   ;;  %s557_s0 = inlined_call_operand.vmem [shape: bf16[8,128], index: 0, kind: input, shape index: {}]   ;;  %s558_s1 = inlined_call_operand.vmem [shape: bf16[64,8], index: 1, kind: input, shape index: {}]   ;;  %s559_s2 = inlined_call_operand.vmem [shape: f32[64,1], index: 2, kind: input, shape index: {}]   ;;  %s560_s3 = inlined_call_operand.vmem [shape: bf16[64,64], index: 3, kind: input, shape index: {}]   ;;  %s561_s4 = inlined_call_operand.vmem [shape: f32[64,1], index: 4, kind: input, shape index: {}]   ;;  %s562_s5 = inlined_call_operand.vmem [shape: bf16[8,64], index: 5, kind: input, shape index: {}]   ;;  %s563_s6 = inlined_call_operand.vmem [shape: f32[8,1], index: 6, kind: input, shape index: {}]   ;;  %s564_s7 = inlined_call_operand.hbm [shape: f32[8,128], index: 7, kind: output, shape index: {}]  }
   0x1   :  { %v43_v0 = vld [vmem:[%s559_s2 + $0x30] sm:$0xff]  ;;  %v28_v1 = vld [vmem:[%s557_s0] sm:$0xf]  ;;  %393 = vset.pattern.permute.xlu0 %v422_v2  ;;  %394 = vset.pattern.permute.xlu1 %v422_v2  ;;  %v377_v6 = vld [vmem:[%s558_s1 + $0x18] sm:$0xff] }
   0x2   :  { %v120_v3 = vsel %vm118_vm0, %v28_v1, 0  ;;  %v374_v4 = vld [vmem:[%s558_s1] sm:$0xff]  ;;  %77 = vperm.xlu0 %393, %v43_v0   ;;  %395 = vset.pattern.permute.xlu2 %v422_v2 }
   0x3   :  { %v41_v5 = vld [vmem:[%s559_s2 + $0x20] sm:$0xff]  ;;  %129 = vmatpush.bf16.msra.mxu0 %v120_v3  ;;  %382 = vmatpush.bf16.msra.mxu1 %v120_v3 }
   0x4   :  { %67 = vperm.xlu1 %394, %v41_v5  }
   0x5   :  { %12 = vsyncpa [#allocation3], 0  ;;  %v39_v7 = vld [vmem:[%s559_s2 + $0x10] sm:$0xff]  ;;  %v44_v8 = vld [vmem:[%s559_s2 + $0x38] sm:$0xff]  ;;  %vm239_vm2 = vcmask 523264   ;;  %s423_s25 = smov [#allocation2]  }
   0x6   :  { %349 = vmatmul.msk.bf16.vlgmr.msra.gmra.mxu0 %vm105_vm1, %v374_v4  ;;  %352 = vmatmul.msk.bf16.vlgmr.msra.gmra.mxu1 %vm105_vm1, %v377_v6  ;;  %v42_v9 = vld [vmem:[%s559_s2 + $0x28] sm:$0xff]  ;;  %v40_v10 = vld [vmem:[%s559_s2 + $0x18] sm:$0xff]  ;;  %v37_v11 = vld [vmem:[%s559_s2] sm:$0xff]  ;;  %s322_s26 = sshll.u32 %s423_s25, 4  ;;  %s324_s29 = sshll.u32 %s564_s7, 4  ;;  %s323_s26 = int_to_ptr.vmem [resolvable:$true] %s322_s26  ;;  %s325_s29 = int_to_ptr.hbm [resolvable:$true] %s324_s29 }
   0x7   :  { %57 = vperm.xlu2 %395, %v39_v7   ;;  %v38_v12 = vld [vmem:[%s559_s2 + $0x8] sm:$0xff]  ;;  %v177_v14 = vld [vmem:[%s561_s4 + $0x30] sm:$0xff]  ;;  %v178_v15 = vld [vmem:[%s561_s4 + $0x38] sm:$0xff] }
   0x8   :  { %v375_v13 = vld [vmem:[%s558_s1 + $0x8] sm:$0xff]  ;;  %v175_v16 = vld [vmem:[%s561_s4 + $0x20] sm:$0xff]  ;;  %v173_v18 = vld [vmem:[%s561_s4 + $0x10] sm:$0xff] }
   0x9   :  { %v176_v17 = vld [vmem:[%s561_s4 + $0x28] sm:$0xff]  ;;  %v174_v19 = vld [vmem:[%s561_s4 + $0x18] sm:$0xff]  ;;  %v376_v20 = vld [vmem:[%s558_s1 + $0x10] sm:$0xff] }
   0xa   :  { %82 = vperm.xlu0 %393, %v44_v8   ;;  %v171_v21 = vld [vmem:[%s561_s4] sm:$0xff]  ;;  %v172_v22 = vld [vmem:[%s561_s4 + $0x8] sm:$0xff]  ;;  %v380_v62 = vld [vmem:[%s560_s3 + $0x10] sm:$0xff] }
   0xb   :  { %v294_v23 = vld [vmem:[%s563_s6] sm:$0xff]  ;;  %v379_v61 = vld [vmem:[%s560_s3 + $0x8] sm:$0xff]  ;;  %v381_v63 = vld [vmem:[%s560_s3 + $0x18] sm:$0xff] }
   0xc   :  { %72 = vperm.xlu1 %394, %v42_v9   ;;  %v378_v60 = vld [vmem:[%s560_s3] sm:$0xff] }
   0xf   :  { %62 = vperm.xlu2 %395, %v40_v10  }
  0x12   :  { %47 = vperm.xlu0 %393, %v37_v11  }
  0x14   :  { %52 = vperm.xlu1 %394, %v38_v12  }
  0x16   :  { %350 = vmatmul.msk.bf16.gmra.mxu0 %vm105_vm1, %v375_v13 }
  0x17   :  { %211 = vperm.xlu2 %395, %v177_v14  }
  0x1a   :  { %216 = vperm.xlu0 %393, %v178_v15  }
  0x1c   :  { %201 = vperm.xlu1 %394, %v175_v16  }
  0x1f   :  { %206 = vperm.xlu2 %395, %v176_v17  }
  0x22   :  { %191 = vperm.xlu0 %393, %v173_v18  }
  0x24   :  { %196 = vperm.xlu1 %394, %v174_v19  }
  0x26   :  { %351 = vmatmul.msk.bf16.gmra.mxu0 %vm105_vm1, %v376_v20 }
  0x27   :  { %181 = vperm.xlu2 %395, %v171_v21  }
  0x2a   :  { %186 = vperm.xlu0 %393, %v172_v22  }
  0x2c   :  { %297 = vperm.xlu1 %394, %v294_v23  }
  0x61   :  { %v58_v38 = vpop.permute.xlu2 %57 }
  0x69   :  { %v63_v42 = vpop.permute.xlu2 %62 }
  0x71   :  { %v212_v3 = vpop.permute.xlu2 %211 }
  0x74   :  { %v78_v24 = vpop.permute.xlu0 %77 }
  0x76   :  { %v68_v36 = vpop.permute.xlu1 %67 }
  0x79   :  { %v207_v10 = vpop.permute.xlu2 %206 }
  0x7c   :  { %v83_v29 = vpop.permute.xlu0 %82 }
  0x7e   :  { %v73_v39 = vpop.permute.xlu1 %72 }
  0x83   :  { %v131_v25 = vpop.f32.mrf.mxu0  ;;  %v146_v26 = vpop.f32.mrf.mxu1 }
  0x84   :  { %v147_v27 = vadd.f32 %v146_v26, %v78_v24  ;;  %v48_v50 = vpop.permute.xlu0 %47 }
  0x85   :  { %v132_v54 = vadd.f32 %v131_v25, %v48_v50 }
  0x86   :  { %v157_v31 = vmax.f32 %v147_v27, 0.0  ;;  %v53_v46 = vpop.permute.xlu1 %52 }
  0x87   :  { %v151_v58 = vmax.f32 %v132_v54, 0.0 }
  0x8b   :  { %v133_v28 = vpop.f32.mrf.mxu0  ;;  %v148_v30 = vpop.f32.mrf.mxu1 }
  0x8c   :  { %v149_v32 = vadd.f32 %v148_v30, %v83_v29  ;;  %v134_v51 = vadd.f32 %v133_v28, %v53_v46  ;;  %v217_v2 = vpop.permute.xlu0 %216  ;;  %v182_v29 = vpop.permute.xlu2 %181 }
  0x8e   :  { %v158_v33 = vmax.f32 %v149_v32, 0.0  ;;  %v152_v56 = vmax.f32 %v134_v51, 0.0  ;;  %v202_v6 = vpop.permute.xlu1 %201 }
  0x90   :  { %v162_v34 = vpack.c.bf16 %v158_v33, %v157_v31  ;;  %v159_v59 = vpack.c.bf16 %v152_v56, %v151_v58 }
  0x92   :  { %256 = vmatpush.bf16.msrb.mxu1 %v162_v34  ;;  %383 = vmatpush.bf16.msra.mxu2 %v162_v34 }
  0x93   :  { %v136_v35 = vpop.f32.mrf.mxu0  ;;  %384 = vmatpush.bf16.msra.mxu3 %v162_v34 }
  0x94   :  { %v137_v47 = vadd.f32 %v136_v35, %v58_v38  ;;  %v192_v8 = vpop.permute.xlu0 %191 }
  0x96   :  { %v153_v55 = vmax.f32 %v137_v47, 0.0  ;;  %v197_v18 = vpop.permute.xlu1 %196 }
  0x9b   :  { %v138_v37 = vpop.f32.mrf.mxu0 }
  0x9c   :  { %v139_v44 = vadd.f32 %v138_v37, %v63_v42  ;;  %v187_v25 = vpop.permute.xlu0 %186 }
  0x9e   :  { %v154_v52 = vmax.f32 %v139_v44, 0.0  ;;  %v298_v37 = vpop.permute.xlu1 %297 }
  0xa0   :  { %v160_v57 = vpack.c.bf16 %v154_v52, %v153_v55 }
  0xa3   :  { %v141_v40 = vpop.f32.mrf.mxu0 }
  0xa4   :  { %v142_v41 = vadd.f32 %v141_v40, %v68_v36  ;;  %v293_v36 = vld [vmem:[%s562_s5] sm:$0xf] }
  0xa6   :  { %v155_v48 = vmax.f32 %v142_v41, 0.0 }
  0xab   :  { %v143_v43 = vpop.f32.mrf.mxu0 }
  0xac   :  { %v144_v45 = vadd.f32 %v143_v43, %v73_v39 }
  0xae   :  { %v156_v49 = vmax.f32 %v144_v45, 0.0 }
  0xb0   :  { %v161_v53 = vpack.c.bf16 %v156_v49, %v155_v48 }
  0xb2   :  { %257 = vmatpush.bf16.msrb.mxu1 %v161_v53  ;;  %385 = vmatpush.bf16.msra.mxu2 %v161_v53 }
  0xb3   :  { %386 = vmatpush.bf16.msra.mxu3 %v161_v53 }
  0xb6   :  { %258 = vmatpush.bf16.msrb.mxu1 %v160_v57  ;;  %387 = vmatpush.bf16.msra.mxu2 %v160_v57 }
  0xb7   :  { %388 = vmatpush.bf16.msra.mxu3 %v160_v57 }
  0xba   :  { %259 = vmatpush.bf16.msrb.mxu1 %v159_v59  ;;  %389 = vmatpush.bf16.msra.mxu2 %v159_v59 }
  0xbb   :  { %390 = vmatpush.bf16.msra.mxu3 %v159_v59 }
  0xbd   :  { %369 = vmatmul.msk.bf16.vlgmr.msrb.gmra.mxu1 %vm239_vm2, %v378_v60  ;;  %370 = vmatmul.msk.bf16.vlgmr.msra.gmra.mxu2 %vm239_vm2, %v379_v61 }
  0xbe   :  { %371 = vmatmul.msk.bf16.vlgmr.msra.gmra.mxu3 %vm239_vm2, %v380_v62 }
  0xce   :  { %372 = vmatmul.msk.bf16.gmra.mxu3 %vm239_vm2, %v381_v63 }
 0x13a   :  { %v261_v7 = vpop.f32.mrf.mxu1 }
 0x13b   :  { %v262_v30 = vadd.f32 %v261_v7, %v182_v29 }
 0x13d   :  { %v281_v34 = vmax.f32 %v262_v30, 0.0 }
 0x140   :  { %v266_v4 = vpop.f32.mrf.mxu2 }
 0x141   :  { %v271_v0 = vpop.f32.mrf.mxu3  ;;  %v267_v23 = vadd.f32 %v266_v4, %v192_v8 }
 0x142   :  { %v272_v15 = vadd.f32 %v271_v0, %v202_v6  ;;  %v263_v22 = vpop.f32.mrf.mxu1 }
 0x143   :  { %v264_v26 = vadd.f32 %v263_v22, %v187_v25  ;;  %v283_v31 = vmax.f32 %v267_v23, 0.0 }
 0x144   :  { %v285_v24 = vmax.f32 %v272_v15, 0.0 }
 0x145   :  { %v282_v32 = vmax.f32 %v264_v26, 0.0 }
 0x147   :  { %v289_v35 = vpack.c.bf16 %v282_v32, %v281_v34 }
 0x148   :  { %v268_v14 = vpop.f32.mrf.mxu2 }
 0x149   :  { %v273_v1 = vpop.f32.mrf.mxu3  ;;  %v269_v19 = vadd.f32 %v268_v14, %v197_v18 }
 0x14a   :  { %v274_v12 = vadd.f32 %v273_v1, %v207_v10 }
 0x14b   :  { %v284_v27 = vmax.f32 %v269_v19, 0.0 }
 0x14c   :  { %v286_v20 = vmax.f32 %v274_v12, 0.0 }
 0x14d   :  { %v290_v33 = vpack.c.bf16 %v284_v27, %v283_v31 }
 0x14e   :  { %v291_v28 = vpack.c.bf16 %v286_v20, %v285_v24 }
 0x151   :  { %v276_v5 = vpop.f32.mrf.mxu3 }
 0x152   :  { %v277_v9 = vadd.f32 %v276_v5, %v212_v3 }
 0x154   :  { %v287_v16 = vmax.f32 %v277_v9, 0.0 }
 0x159   :  { %v278_v11 = vpop.f32.mrf.mxu3 }
 0x15a   :  { %v279_v13 = vadd.f32 %v278_v11, %v217_v2 }
 0x15c   :  { %v288_v17 = vmax.f32 %v279_v13, 0.0 }
 0x15e   :  { %v292_v21 = vpack.c.bf16 %v288_v17, %v287_v16 }
 0x160   :  { %307 = vmatpush.bf16.msrb.mxu2 %v292_v21 }
 0x164   :  { %308 = vmatpush.bf16.msrb.mxu2 %v291_v28 }
 0x168   :  { %309 = vmatpush.bf16.msrb.mxu2 %v290_v33 }
 0x16c   :  { %310 = vmatpush.bf16.msrb.mxu2 %v289_v35 }
 0x16f   :  { %373 = vmatmul.msk.bf16.vlgmr.msrb.gmra.mxu2 %vm239_vm2, %v293_v36 }
 0x1f2   :  { %v312_v38 = vpop.f32.mrf.mxu2 }
 0x1f3   :  { %v313_v39 = vadd.f32 %v312_v38, %v298_v37 }
 0x1f5   :  { %316 = vst [vmem:[#allocation2] sm:$0xff] %v313_v39 }
 0x1f6   :  { %327 = dma.vmem_to_hbm [thread:$0]  %s323_s26, 128, %s325_s29, [#allocation3]  }
 0x1fa   :  { %v314_v40 = vpop.f32.mrf.mxu2 }
 0x1fb   :  { %420 = dma.done.wait [#allocation3], 128  }
 0x1fc   :  { %421 = vsyncadd [#allocation3], 4294967168 }
 0x1fd   :  { %332 = vsyncpa [#allocation3], 1 }

</bundles_post_ra>
